<compile_context>
chip_gen: v5e
topology: v5e:2x2
jax: 0.10.0
libtpu: 0.0.40
codegen_flags: <defaults>
</compile_context>

<pallas_src>
import functools

import jax
import jax.numpy as jnp
from jax import lax
from jax.experimental import pallas as pl
from jax.experimental.pallas import tpu as pltpu

F32 = jnp.float32


def _l2_normalize(x, eps=1e-12):
    n = jnp.sqrt(jnp.sum(x * x, axis=-1, keepdims=True))
    return x / jnp.maximum(n, eps)


def _vmem_spec():
    return pl.BlockSpec(memory_space=pltpu.MemorySpace.VMEM)


def _smem_spec():
    return pl.BlockSpec(memory_space=pltpu.MemorySpace.SMEM)


def _round_up(x, m):
    return -(-x // m) * m


# ---------------------------------------------------------------------------
# Fused ITC (image-text contrastive loss) + hard-negative mining
# ---------------------------------------------------------------------------
def _itc_hn_kernel(invt_ref, q_ref, t_ref, loss_ref, img_idx_ref, txt_idx_ref):
    B, Q, D = q_ref.shape

    # Mean-pool queries with f32 accumulation, one (B, D) slice at a time
    # (no full (B, Q, D) f32 materialization -- VMEM-friendly on v7x).
    img = jnp.zeros((B, D), F32)
    for j in range(Q):                               # Q is small & static
        img = img + q_ref[:, j, :].astype(F32)
    img = _l2_normalize(img * (1.0 / Q))             # (B, D) f32
    txt = _l2_normalize(t_ref[...].astype(F32))      # (B, D) f32

    # Two tiny NT matmuls (contract last dims of both operands); avoids
    # materializing a (B, B) transpose for the t2i direction.
    img_b = img.astype(q_ref.dtype)
    txt_b = txt.astype(q_ref.dtype)
    dn = (((1,), (1,)), ((), ()))
    sim = lax.dot_general(img_b, txt_b, dn, preferred_element_type=F32)    # i2t (B,B)
    sim_t = lax.dot_general(txt_b, img_b, dn, preferred_element_type=F32)  # t2i (B,B)

    inv_t = invt_ref[0, 0]
    row_i = lax.broadcasted_iota(jnp.int32, (B, B), 0)
    col_i = lax.broadcasted_iota(jnp.int32, (B, B), 1)
    eye = row_i == col_i

    def _row_ce(s):                      # CE with labels = arange(B); returns (1,1)
        s = s * inv_t
        diag = jnp.sum(jnp.where(eye, s, 0.0), axis=1, keepdims=True)      # (B,1)
        m = jnp.max(s, axis=1, keepdims=True)
        lse = jnp.log(jnp.sum(jnp.exp(s - m), axis=1, keepdims=True)) + m
        return jnp.sum(lse - diag, axis=0, keepdims=True) * (1.0 / B)      # (1,1)

    loss_ref[...] = 0.5 * (_row_ce(sim) + _row_ce(sim_t))

    # Hard-negative mining: argmax over off-diagonal similarities
    # (ties broken to the lowest index, matching torch.topk(k=1)).
    sm = jnp.where(eye, -1e30, sim)
    sm_t = jnp.where(eye, -1e30, sim_t)

    mx_r = jnp.max(sm, axis=1, keepdims=True)                              # (B,1)
    txt_idx = jnp.min(jnp.where(sm == mx_r, col_i, B), axis=1, keepdims=True)
    mx_c = jnp.max(sm_t, axis=1, keepdims=True)
    img_idx = jnp.min(jnp.where(sm_t == mx_c, col_i, B), axis=1, keepdims=True)

    txt_idx_ref[...] = txt_idx.astype(jnp.int32)     # hardest text per image
    img_idx_ref[...] = img_idx.astype(jnp.int32)     # hardest image per text


def itc_and_hard_negatives(query_features, text_features, temperature):
    B = query_features.shape[0]
    inv_t = (1.0 / jnp.asarray(temperature, F32)).reshape(1, 1)
    loss, img_idx, txt_idx = pl.pallas_call(
        _itc_hn_kernel,
        out_shape=(jax.ShapeDtypeStruct((1, 1), F32),
                   jax.ShapeDtypeStruct((B, 1), jnp.int32),
                   jax.ShapeDtypeStruct((B, 1), jnp.int32)),
        in_specs=[_smem_spec(), _vmem_spec(), _vmem_spec()],
        out_specs=(_vmem_spec(), _vmem_spec(), _vmem_spec()),
    )(inv_t, query_features, text_features)
    return loss[0, 0], img_idx.reshape(B), txt_idx.reshape(B)


# ---------------------------------------------------------------------------
# ITG: tiled LM head (weight-tied linear) + shifted masked cross-entropy
# (online softmax over vocab chunks; target gather hoisted out of the loop)
# ---------------------------------------------------------------------------
def _itg_kernel(hid_ref, lbl_ref, wlbl_ref, wemb_ref, out_ref,
                m_sc, l_sc, t_sc, *, v_actual, v_padded, tv):
    k = pl.program_id(1)

    @pl.when(k == 0)
    def _():
        m_sc[...] = jnp.full_like(m_sc, -1e30)
        l_sc[...] = jnp.zeros_like(l_sc)
        # Target logit: one per-row dot over D per row block (VPU mul + lane
        # reduce), instead of a per-chunk compare/select over every logit.
        t_sc[...] = jnp.sum(hid_ref[...].astype(F32) * wlbl_ref[...].astype(F32),
                            axis=1, keepdims=True)

    # (tm, tv) logits chunk: NT dot_general (contract last dims), bf16 operands
    # into the MXU, f32 accumulation -- no transpose of the weight tile.
    logits = lax.dot_general(hid_ref[...], wemb_ref[...],
                             dimension_numbers=(((1,), (1,)), ((), ())),
                             preferred_element_type=F32)

    if v_padded != v_actual:
        # Only emitted when the vocab needed padding; chunk-local iota vs a
        # scalar limit (no-op on all but the last chunk).
        col = lax.broadcasted_iota(jnp.int32, logits.shape, 1)
        logits = jnp.where(col < (v_actual - k * tv), logits, -1e30)

    # Online softmax statistics (per row).
    m_new = jnp.maximum(m_sc[...], jnp.max(logits, axis=1, keepdims=True))
    alpha = jnp.exp(m_sc[...] - m_new)
    l_sc[...] = alpha * l_sc[...] + jnp.sum(jnp.exp(logits - m_new),
                                            axis=1, keepdims=True)
    m_sc[...] = m_new

    @pl.when(k == pl.num_programs(1) - 1)
    def _():
        valid = (lbl_ref[...] != -100).astype(F32)            # (tm, 1)
        out_ref[...] = (m_sc[...] + jnp.log(l_sc[...]) - t_sc[...]) * valid


def itg_loss_pallas(shift_hidden, word_embeddings, shift_labels, *,
                    tm=512, tv=1024, vmem_limit_bytes=48 * 1024 * 1024):
    """Per-generation tile guidance: tm>=256 (v5e), 512 (v7x), 768-1024 (v6e)."""
    N, D = shift_hidden.shape
    V = word_embeddings.shape[0]

    # --- tile selection ---
    tm = max(8, min(tm, _round_up(N, 8)))
    # Keep at least 2 row blocks for reasonable N so the "parallel" row axis can
    # still shard across v7x's 2 TensorCores.
    if _round_up(N, tm) // tm < 2 and N > 256:
        tm = max(128, _round_up(pl.cdiv(N, 2), 128))
    tv = max(8, min(tv, _round_up(V, 8)))

    Np = _round_up(N, tm)
    Vp = _round_up(V, tv)

    hid = shift_hidden if Np == N else jnp.pad(shift_hidden, ((0, Np - N), (0, 0)))
    lbl = shift_labels if Np == N else jnp.pad(
        shift_labels, ((0, Np - N), (0, 0)), constant_values=-100)
    wemb = word_embeddings if Vp == V else jnp.pad(word_embeddings,
                                                   ((0, Vp - V), (0, 0)))

    # Gather the label rows of the weight table once (hoisted out of the vocab
    # loop); ignore_index rows are clamped to 0 and masked out at finalize.
    w_lbl = jnp.take(word_embeddings, jnp.clip(shift_labels[:, 0], 0, V - 1), axis=0)
    w_lbl = w_lbl if Np == N else jnp.pad(w_lbl, ((0, Np - N), (0, 0)))

    kernel = functools.partial(_itg_kernel, v_actual=V, v_padded=Vp, tv=tv)
    row_blocks = Np // tm
    bytes_accessed = int(
        Np * D * hid.dtype.itemsize          # hidden states
        + Np * D * w_lbl.dtype.itemsize      # gathered target rows
        + Np * 4 + Np * 4                    # labels + per-row output
        + row_blocks * Vp * D * wemb.dtype.itemsize)   # weight table re-streamed per row block

    per_row = pl.pallas_call(
        kernel,
        out_shape=jax.ShapeDtypeStruct((Np, 1), F32),
        grid_spec=pltpu.PrefetchScalarGridSpec(
            num_scalar_prefetch=0,
            grid=(row_blocks, Vp // tv),     # rows parallel, vocab = reduction (last)
            in_specs=[pl.BlockSpec((tm, D), lambda i, k: (i, 0)),
                      pl.BlockSpec((tm, 1), lambda i, k: (i, 0)),
                      pl.BlockSpec((tm, D), lambda i, k: (i, 0)),
                      pl.BlockSpec((tv, D), lambda i, k: (k, 0))],
            out_specs=pl.BlockSpec((tm, 1), lambda i, k: (i, 0)),
            scratch_shapes=[pltpu.VMEM((tm, 1), F32)] * 3),
        compiler_params=pltpu.CompilerParams(
            dimension_semantics=("parallel", "arbitrary"),
            vmem_limit_bytes=vmem_limit_bytes),
        cost_estimate=pl.CostEstimate(
            flops=int(2 * Np * Vp * D + 2 * Np * D),
            transcendentals=int(Np * Vp),
            bytes_accessed=bytes_accessed),
    )(hid, lbl, w_lbl, wemb)

    valid = jnp.sum((shift_labels != -100).astype(F32))
    # TODO(synk): PyTorch CrossEntropyLoss returns NaN when every target is
    # ignore_index; we clamp the denominator to 1.0 instead (returns 0).
    return jnp.sum(per_row) / jnp.maximum(valid, 1.0)


# ---------------------------------------------------------------------------
# ITM: 2-way head + cross-entropy, one kernel invocation over all gathered rows
# ---------------------------------------------------------------------------
def _itm_kernel(cls_ref, w_ref, b_ref, lbl_ref, out_ref):
    cls = cls_ref[...].astype(F32)                    # (N, D)
    w0 = w_ref[0:1, :].astype(F32)                    # (1, D)
    w1 = w_ref[1:2, :].astype(F32)

    # Two logits via VPU mul + lane reduction (no lane-sparse (N,2) MXU matmul).
    logit0 = jnp.sum(cls * w0, axis=1, keepdims=True) + b_ref[0]   # (N, 1)
    logit1 = jnp.sum(cls * w1, axis=1, keepdims=True) + b_ref[1]

    m = jnp.maximum(logit0, logit1)
    lse = jnp.log(jnp.exp(logit0 - m) + jnp.exp(logit1 - m)) + m
    tgt = jnp.where(lbl_ref[...] == 1, logit1, logit0)
    out_ref[...] = lse - tgt                                        # per-row CE


def itm_loss_pallas(cls_rows, itm_w, itm_b, itm_labels):
    n = cls_rows.shape[0]
    per_row = pl.pallas_call(
        _itm_kernel,
        out_shape=jax.ShapeDtypeStruct((n, 1), F32),
        in_specs=[_vmem_spec(), _vmem_spec(), _smem_spec(), _vmem_spec()],
        out_specs=_vmem_spec(),
    )(cls_rows, itm_w, itm_b, itm_labels.reshape(n, 1).astype(jnp.int32))
    return jnp.mean(per_row)


# ---------------------------------------------------------------------------
# Forward (mirrors QFormerLosses.forward, with external sub-models stubbed)
# ---------------------------------------------------------------------------
def qformer_losses_forward(query_features, text_features, text_embeddings,
                           attention_mask, labels, word_embeddings,
                           itm_w, itm_b, *,
                           temperature=0.07, hard_negative_ratio=0.5,
                           itc_weight=1.0, itg_weight=1.0, itm_weight=1.0,
                           itg_tm=512, itg_tv=1024):
    B, Q, D = query_features.shape
    L = text_embeddings.shape[1]
    losses = {}

    # --- ITC + hard-negative mining (fused: shared pooling / normalize / matmuls) ---
    itc, hard_neg_img_idx, hard_neg_txt_idx = itc_and_hard_negatives(
        query_features, text_features, temperature)
    losses["itc_loss"] = itc * itc_weight

    # --- ITG ---
    # TODO(synk): model.qformer.encoder (full transformer over [queries; text]) is an
    # external module; stand-in: text hidden states fed to the LM head = text embeddings.
    text_hidden_states = text_embeddings
    shift_hidden = text_hidden_states[:, :-1, :].reshape(B * (L - 1), D)
    shift_labels = labels[:, 1:].reshape(B * (L - 1), 1).astype(jnp.int32)
    losses["itg_loss"] = itg_loss_pallas(shift_hidden, word_embeddings, shift_labels,
                                         tm=itg_tm, tv=itg_tv) * itg_weight

    # --- ITM ---
    num_hard = int(B * hard_negative_ratio)
    if num_hard > 0:
        gather_idx = jnp.concatenate(
            [jnp.arange(B, dtype=jnp.int32),
             hard_neg_img_idx[:num_hard].astype(jnp.int32)], axis=0)
        itm_labels = jnp.concatenate(
            [jnp.ones((B,), jnp.int32), jnp.zeros((num_hard,), jnp.int32)], axis=0)
    else:
        gather_idx = jnp.arange(B, dtype=jnp.int32)
        itm_labels = jnp.ones((B,), jnp.int32)
    # TODO(synk): the Q-Former encoder forward over [gathered queries; gathered text
    # (hard_neg_txt_idx); attention_mask] is external; stand-in CLS output = first
    # query token of each gathered sample, so text_embeddings / attention_mask /
    # hard_neg_txt_idx don't feed the stubbed head.
    del hard_neg_txt_idx, attention_mask
    cls_rows = jnp.take(query_features[:, 0, :], gather_idx, axis=0)   # (n_total, D)
    losses["itm_loss"] = itm_loss_pallas(cls_rows, itm_w, itm_b, itm_labels) * itm_weight

    losses["total_loss"] = losses["itc_loss"] + losses["itg_loss"] + losses["itm_loss"]
    return losses


if __name__ == "__main__":
    key = jax.random.PRNGKey(0)
    B, Q, D, L, V = 4, 8, 64, 8, 200
    k0, k1, k2, k3, k4 = jax.random.split(key, 5)

    # TODO(synk): vision_model / qformer are external models; deterministic random
    # stand-ins are used for their outputs (query_features, text_embeddings).
    query_features = jax.random.normal(k0, (B, Q, D), jnp.bfloat16)
    text_embeddings = jax.random.normal(k1, (B, L, D), jnp.bfloat16)
    text_features = text_embeddings[:, 0, :]               # text [CLS] features
    attention_mask = jnp.ones((B, L), jnp.int32)            # (unused by stubbed encoder)
    labels = jax.random.randint(k2, (B, L), 0, V).astype(jnp.int32)
    labels = labels.at[:, -1].set(-100)                     # exercise ignore_index

    # Parameters: tied word embeddings (V, D) bf16; itm_head Linear(D, 2).
    word_embeddings = (jax.random.normal(k3, (V, D), F32) * 0.02).astype(jnp.bfloat16)
    itm_w = (jax.random.normal(k4, (2, D), F32) * 0.02).astype(jnp.bfloat16)
    itm_b = jnp.zeros((2,), F32)

    losses = qformer_losses_forward(
        query_features, text_features, text_embeddings, attention_mask, labels,
        word_embeddings, itm_w, itm_b,
        temperature=0.07, hard_negative_ratio=0.5,
        itc_weight=1.0, itg_weight=1.0, itm_weight=1.0,
        itg_tm=16, itg_tv=128)   # toy tiles: 2 row blocks + 2 vocab chunks (+ padding)

    jax.block_until_ready(losses)
    print("KERNEL_OK")
</pallas_src>

<mosaic_0001>
module attributes {stable_mosaic.version = 11 : i64} {
  func.func @_itc_hn_kernel(%arg0: memref<1x1xf32, #tpu.memory_space<smem>>, %arg1: memref<4x8x64xbf16, #tpu.memory_space<vmem>>, %arg2: memref<4x64xbf16, #tpu.memory_space<vmem>>, %arg3: memref<1x1xf32, #tpu.memory_space<vmem>>, %arg4: memref<4x1xi32, #tpu.memory_space<vmem>>, %arg5: memref<4x1xi32, #tpu.memory_space<vmem>>) attributes {dimension_semantics = [], scalar_prefetch = 0 : i64, scratch_operands = 0 : i64, tpu.core_type = #tpu.core_type<tc>} {
    %cst = arith.constant 0.000000e+00 : f32
    %0 = vector.broadcast %cst : f32 to vector<4x64xf32>
    %c0 = arith.constant 0 : index
    %c0_0 = arith.constant 0 : index
    %c0_1 = arith.constant 0 : index
    %1 = vector.load %arg1[%c0, %c0_0, %c0_1] : memref<4x8x64xbf16, #tpu.memory_space<vmem>>, vector<4x1x64xbf16>
    %2 = vector.shape_cast %1 : vector<4x1x64xbf16> to vector<4x64xbf16>
    %3 = arith.extf %2 : vector<4x64xbf16> to vector<4x64xf32>
    %4 = arith.addf %0, %3 : vector<4x64xf32>
    %c0_2 = arith.constant 0 : index
    %c1 = arith.constant 1 : index
    %c0_3 = arith.constant 0 : index
    %5 = vector.load %arg1[%c0_2, %c1, %c0_3] : memref<4x8x64xbf16, #tpu.memory_space<vmem>>, vector<4x1x64xbf16>
    %6 = vector.shape_cast %5 : vector<4x1x64xbf16> to vector<4x64xbf16>
    %7 = arith.extf %6 : vector<4x64xbf16> to vector<4x64xf32>
    %8 = arith.addf %4, %7 : vector<4x64xf32>
    %c0_4 = arith.constant 0 : index
    %c2 = arith.constant 2 : index
    %c0_5 = arith.constant 0 : index
    %9 = vector.load %arg1[%c0_4, %c2, %c0_5] : memref<4x8x64xbf16, #tpu.memory_space<vmem>>, vector<4x1x64xbf16>
    %10 = vector.shape_cast %9 : vector<4x1x64xbf16> to vector<4x64xbf16>
    %11 = arith.extf %10 : vector<4x64xbf16> to vector<4x64xf32>
    %12 = arith.addf %8, %11 : vector<4x64xf32>
    %c0_6 = arith.constant 0 : index
    %c3 = arith.constant 3 : index
    %c0_7 = arith.constant 0 : index
    %13 = vector.load %arg1[%c0_6, %c3, %c0_7] : memref<4x8x64xbf16, #tpu.memory_space<vmem>>, vector<4x1x64xbf16>
    %14 = vector.shape_cast %13 : vector<4x1x64xbf16> to vector<4x64xbf16>
    %15 = arith.extf %14 : vector<4x64xbf16> to vector<4x64xf32>
    %16 = arith.addf %12, %15 : vector<4x64xf32>
    %c0_8 = arith.constant 0 : index
    %c4 = arith.constant 4 : index
    %c0_9 = arith.constant 0 : index
    %17 = vector.load %arg1[%c0_8, %c4, %c0_9] : memref<4x8x64xbf16, #tpu.memory_space<vmem>>, vector<4x1x64xbf16>
    %18 = vector.shape_cast %17 : vector<4x1x64xbf16> to vector<4x64xbf16>
    %19 = arith.extf %18 : vector<4x64xbf16> to vector<4x64xf32>
    %20 = arith.addf %16, %19 : vector<4x64xf32>
    %c0_10 = arith.constant 0 : index
    %c5 = arith.constant 5 : index
    %c0_11 = arith.constant 0 : index
    %21 = vector.load %arg1[%c0_10, %c5, %c0_11] : memref<4x8x64xbf16, #tpu.memory_space<vmem>>, vector<4x1x64xbf16>
    %22 = vector.shape_cast %21 : vector<4x1x64xbf16> to vector<4x64xbf16>
    %23 = arith.extf %22 : vector<4x64xbf16> to vector<4x64xf32>
    %24 = arith.addf %20, %23 : vector<4x64xf32>
    %c0_12 = arith.constant 0 : index
    %c6 = arith.constant 6 : index
    %c0_13 = arith.constant 0 : index
    %25 = vector.load %arg1[%c0_12, %c6, %c0_13] : memref<4x8x64xbf16, #tpu.memory_space<vmem>>, vector<4x1x64xbf16>
    %26 = vector.shape_cast %25 : vector<4x1x64xbf16> to vector<4x64xbf16>
    %27 = arith.extf %26 : vector<4x64xbf16> to vector<4x64xf32>
    %28 = arith.addf %24, %27 : vector<4x64xf32>
    %c0_14 = arith.constant 0 : index
    %c7 = arith.constant 7 : index
    %c0_15 = arith.constant 0 : index
    %29 = vector.load %arg1[%c0_14, %c7, %c0_15] : memref<4x8x64xbf16, #tpu.memory_space<vmem>>, vector<4x1x64xbf16>
    %30 = vector.shape_cast %29 : vector<4x1x64xbf16> to vector<4x64xbf16>
    %31 = arith.extf %30 : vector<4x64xbf16> to vector<4x64xf32>
    %32 = arith.addf %28, %31 : vector<4x64xf32>
    %cst_16 = arith.constant 1.250000e-01 : f32
    %33 = vector.broadcast %cst_16 : f32 to vector<4x64xf32>
    %34 = arith.mulf %32, %33 : vector<4x64xf32>
    %35 = arith.mulf %34, %34 : vector<4x64xf32>
    %cst_17 = arith.constant dense<0.000000e+00> : vector<4xf32>
    %36 = vector.multi_reduction <add>, %35, %cst_17 [1] : vector<4x64xf32> to vector<4xf32>
    %37 = vector.shape_cast %36 : vector<4xf32> to vector<4x1xf32>
    %38 = math.sqrt %37 : vector<4x1xf32>
    %cst_18 = arith.constant 9.99999996E-13 : f32
    %39 = vector.broadcast %cst_18 : f32 to vector<4x1xf32>
    %40 = arith.maximumf %38, %39 : vector<4x1xf32>
    %41 = vector.broadcast %40 : vector<4x1xf32> to vector<4x64xf32>
    %42 = arith.divf %34, %41 : vector<4x64xf32>
    %c0_19 = arith.constant 0 : index
    %c0_20 = arith.constant 0 : index
    %43 = vector.load %arg2[%c0_19, %c0_20] : memref<4x64xbf16, #tpu.memory_space<vmem>>, vector<4x64xbf16>
    %44 = arith.extf %43 : vector<4x64xbf16> to vector<4x64xf32>
    %45 = arith.mulf %44, %44 : vector<4x64xf32>
    %cst_21 = arith.constant dense<0.000000e+00> : vector<4xf32>
    %46 = vector.multi_reduction <add>, %45, %cst_21 [1] : vector<4x64xf32> to vector<4xf32>
    %47 = vector.shape_cast %46 : vector<4xf32> to vector<4x1xf32>
    %48 = math.sqrt %47 : vector<4x1xf32>
    %cst_22 = arith.constant 9.99999996E-13 : f32
    %49 = vector.broadcast %cst_22 : f32 to vector<4x1xf32>
    %50 = arith.maximumf %48, %49 : vector<4x1xf32>
    %51 = vector.broadcast %50 : vector<4x1xf32> to vector<4x64xf32>
    %52 = arith.divf %44, %51 : vector<4x64xf32>
    %53 = arith.truncf %42 : vector<4x64xf32> to vector<4x64xbf16>
    %54 = arith.truncf %52 : vector<4x64xf32> to vector<4x64xbf16>
    %cst_23 = arith.constant dense<0.000000e+00> : vector<4x4xf32>
    %55 = tpu.matmul %53, %54, %cst_23 {dimension_numbers = #tpu.dot_dimension_numbers<[1], [1], [0], [0], [0, 0, 1, 0], [], []>} : vector<4x64xbf16>, vector<4x64xbf16>, vector<4x4xf32> -> vector<4x4xf32>
    %cst_24 = arith.constant dense<0.000000e+00> : vector<4x4xf32>
    %56 = tpu.matmul %54, %53, %cst_24 {dimension_numbers = #tpu.dot_dimension_numbers<[1], [1], [0], [0], [0, 0, 1, 0], [], []>} : vector<4x64xbf16>, vector<4x64xbf16>, vector<4x4xf32> -> vector<4x4xf32>
    %c0_25 = arith.constant 0 : index
    %c0_26 = arith.constant 0 : index
    %57 = memref.load %arg0[%c0_25, %c0_26] : memref<1x1xf32, #tpu.memory_space<smem>>
    %58 = tpu.iota {dimensions = array<i32: 0>} : vector<4x4xi32>
    %59 = tpu.iota {dimensions = array<i32: 1>} : vector<4x4xi32>
    %60 = arith.cmpi eq, %58, %59 : vector<4x4xi32>
    %61 = vector.broadcast %57 : f32 to vector<4x4xf32>
    %62 = arith.mulf %55, %61 : vector<4x4xf32>
    %cst_27 = arith.constant 0.000000e+00 : f32
    %63 = vector.broadcast %cst_27 : f32 to vector<4x4xf32>
    %64 = arith.select %60, %62, %63 : vector<4x4xi1>, vector<4x4xf32>
    %cst_28 = arith.constant dense<0.000000e+00> : vector<4xf32>
    %65 = vector.multi_reduction <add>, %64, %cst_28 [1] : vector<4x4xf32> to vector<4xf32>
    %66 = vector.shape_cast %65 : vector<4xf32> to vector<4x1xf32>
    %cst_29 = arith.constant dense<0xFF800000> : vector<4xf32>
    %67 = vector.multi_reduction <maximumf>, %62, %cst_29 [1] : vector<4x4xf32> to vector<4xf32>
    %68 = vector.shape_cast %67 : vector<4xf32> to vector<4x1xf32>
    %69 = vector.broadcast %68 : vector<4x1xf32> to vector<4x4xf32>
    %70 = arith.subf %62, %69 : vector<4x4xf32>
    %71 = math.exp %70 : vector<4x4xf32>
    %cst_30 = arith.constant dense<0.000000e+00> : vector<4xf32>
    %72 = vector.multi_reduction <add>, %71, %cst_30 [1] : vector<4x4xf32> to vector<4xf32>
    %73 = vector.shape_cast %72 : vector<4xf32> to vector<4x1xf32>
    %74 = math.log %73 : vector<4x1xf32>
    %75 = arith.addf %74, %68 : vector<4x1xf32>
    %76 = arith.subf %75, %66 : vector<4x1xf32>
    %cst_31 = arith.constant dense<0.000000e+00> : vector<1xf32>
    %77 = vector.multi_reduction <add>, %76, %cst_31 [0] : vector<4x1xf32> to vector<1xf32>
    %78 = vector.shape_cast %77 : vector<1xf32> to vector<1x1xf32>
    %cst_32 = arith.constant 2.500000e-01 : f32
    %79 = vector.broadcast %cst_32 : f32 to vector<1x1xf32>
    %80 = arith.mulf %78, %79 : vector<1x1xf32>
    %81 = vector.broadcast %57 : f32 to vector<4x4xf32>
    %82 = arith.mulf %56, %81 : vector<4x4xf32>
    %cst_33 = arith.constant 0.000000e+00 : f32
    %83 = vector.broadcast %cst_33 : f32 to vector<4x4xf32>
    %84 = arith.select %60, %82, %83 : vector<4x4xi1>, vector<4x4xf32>
    %cst_34 = arith.constant dense<0.000000e+00> : vector<4xf32>
    %85 = vector.multi_reduction <add>, %84, %cst_34 [1] : vector<4x4xf32> to vector<4xf32>
    %86 = vector.shape_cast %85 : vector<4xf32> to vector<4x1xf32>
    %cst_35 = arith.constant dense<0xFF800000> : vector<4xf32>
    %87 = vector.multi_reduction <maximumf>, %82, %cst_35 [1] : vector<4x4xf32> to vector<4xf32>
    %88 = vector.shape_cast %87 : vector<4xf32> to vector<4x1xf32>
    %89 = vector.broadcast %88 : vector<4x1xf32> to vector<4x4xf32>
    %90 = arith.subf %82, %89 : vector<4x4xf32>
    %91 = math.exp %90 : vector<4x4xf32>
    %cst_36 = arith.constant dense<0.000000e+00> : vector<4xf32>
    %92 = vector.multi_reduction <add>, %91, %cst_36 [1] : vector<4x4xf32> to vector<4xf32>
    %93 = vector.shape_cast %92 : vector<4xf32> to vector<4x1xf32>
    %94 = math.log %93 : vector<4x1xf32>
    %95 = arith.addf %94, %88 : vector<4x1xf32>
    %96 = arith.subf %95, %86 : vector<4x1xf32>
    %cst_37 = arith.constant dense<0.000000e+00> : vector<1xf32>
    %97 = vector.multi_reduction <add>, %96, %cst_37 [0] : vector<4x1xf32> to vector<1xf32>
    %98 = vector.shape_cast %97 : vector<1xf32> to vector<1x1xf32>
    %cst_38 = arith.constant 2.500000e-01 : f32
    %99 = vector.broadcast %cst_38 : f32 to vector<1x1xf32>
    %100 = arith.mulf %98, %99 : vector<1x1xf32>
    %101 = arith.addf %80, %100 : vector<1x1xf32>
    %cst_39 = arith.constant 5.000000e-01 : f32
    %102 = vector.broadcast %cst_39 : f32 to vector<1x1xf32>
    %103 = arith.mulf %102, %101 : vector<1x1xf32>
    %c0_40 = arith.constant 0 : index
    %c0_41 = arith.constant 0 : index
    %104 = vector.load %arg3[%c0_40, %c0_41] : memref<1x1xf32, #tpu.memory_space<vmem>>, vector<1x1xf32>
    tpu.vector_store %arg3[%c0_40, %c0_41], %103 {strides = array<i32>} : memref<1x1xf32, #tpu.memory_space<vmem>>, vector<1x1xf32>,
    %cst_42 = arith.constant -1.000000e+30 : f32
    %105 = vector.broadcast %cst_42 : f32 to vector<4x4xf32>
    %106 = arith.select %60, %105, %55 : vector<4x4xi1>, vector<4x4xf32>
    %cst_43 = arith.constant -1.000000e+30 : f32
    %107 = vector.broadcast %cst_43 : f32 to vector<4x4xf32>
    %108 = arith.select %60, %107, %56 : vector<4x4xi1>, vector<4x4xf32>
    %cst_44 = arith.constant dense<0xFF800000> : vector<4xf32>
    %109 = vector.multi_reduction <maximumf>, %106, %cst_44 [1] : vector<4x4xf32> to vector<4xf32>
    %110 = vector.shape_cast %109 : vector<4xf32> to vector<4x1xf32>
    %111 = vector.broadcast %110 : vector<4x1xf32> to vector<4x4xf32>
    %112 = arith.cmpf oeq, %106, %111 : vector<4x4xf32>
    %c4_i32 = arith.constant 4 : i32
    %113 = vector.broadcast %c4_i32 : i32 to vector<4x4xi32>
    %114 = arith.select %112, %59, %113 : vector<4x4xi1>, vector<4x4xi32>
    %cst_45 = arith.constant dense<2147483647> : vector<4xi32>
    %115 = vector.multi_reduction <minsi>, %114, %cst_45 [1] : vector<4x4xi32> to vector<4xi32>
    %116 = vector.shape_cast %115 : vector<4xi32> to vector<4x1xi32>
    %cst_46 = arith.constant dense<0xFF800000> : vector<4xf32>
    %117 = vector.multi_reduction <maximumf>, %108, %cst_46 [1] : vector<4x4xf32> to vector<4xf32>
    %118 = vector.shape_cast %117 : vector<4xf32> to vector<4x1xf32>
    %119 = vector.broadcast %118 : vector<4x1xf32> to vector<4x4xf32>
    %120 = arith.cmpf oeq, %108, %119 : vector<4x4xf32>
    %c4_i32_47 = arith.constant 4 : i32
    %121 = vector.broadcast %c4_i32_47 : i32 to vector<4x4xi32>
    %122 = arith.select %120, %59, %121 : vector<4x4xi1>, vector<4x4xi32>
    %cst_48 = arith.constant dense<2147483647> : vector<4xi32>
    %123 = vector.multi_reduction <minsi>, %122, %cst_48 [1] : vector<4x4xi32> to vector<4xi32>
    %124 = vector.shape_cast %123 : vector<4xi32> to vector<4x1xi32>
    %c0_49 = arith.constant 0 : index
    %c0_50 = arith.constant 0 : index
    %125 = vector.load %arg5[%c0_49, %c0_50] : memref<4x1xi32, #tpu.memory_space<vmem>>, vector<4x1xi32>
    tpu.vector_store %arg5[%c0_49, %c0_50], %116 {strides = array<i32>} : memref<4x1xi32, #tpu.memory_space<vmem>>, vector<4x1xi32>,
    %c0_51 = arith.constant 0 : index
    %c0_52 = arith.constant 0 : index
    %126 = vector.load %arg4[%c0_51, %c0_52] : memref<4x1xi32, #tpu.memory_space<vmem>>, vector<4x1xi32>
    tpu.vector_store %arg4[%c0_51, %c0_52], %124 {strides = array<i32>} : memref<4x1xi32, #tpu.memory_space<vmem>>, vector<4x1xi32>,
    return
  }
}

</mosaic_0001>

<bundles_post_ra>
// kernel: tpu_custom_call.1
= control target key start
LH: loop header
LB: loop body
LE: loop exit
PB: predicated region body
PF: predicated region fallthrough
CT: control target
= control target key end

     0   :  { %12 = vsyncpa [#allocation4], 0  ;;  %s724_s0 = inlined_call_operand.<no memory space> [shape: f32[1,1], index: 0, kind: input, shape index: {}]   ;;  %s725_s1 = inlined_call_operand.hbm [shape: bf16[4,8,64], index: 1, kind: input, shape index: {}]   ;;  %s726_s2 = inlined_call_operand.vmem [shape: bf16[4,64], index: 2, kind: input, shape index: {}]   ;;  %s727_s3 = inlined_call_operand.hbm [shape: f32[1,1], index: 3, kind: output, shape index: {0}]   ;;  %s728_s4 = inlined_call_operand.vmem [shape: s32[4,1], index: 4, kind: output, shape index: {1}]   ;;  %s729_s5 = inlined_call_operand.vmem [shape: s32[4,1], index: 5, kind: output, shape index: {2}]  }
   0x1   :  { %13 = vsyncpa [#allocation5], 0  ;;  %s20_s20 = sshll.u32 %s725_s1, 4  ;;  %s581_s21 = smov [#allocation3]   ;;  %s21_s20 = int_to_ptr.hbm [resolvable:$true] %s20_s20 }
   0x2   :  { %s22_s22 = sshll.u32 %s581_s21, 4  ;;  %s582_s23 = smov 64   ;;  %s23_s22 = int_to_ptr.vmem [resolvable:$true] %s22_s22 }
   0x3   :  { %s583_s24 = smov 4  }
   0x4   :  { %28 = dma.hbm_to_vmem [thread:$0]  %s21_s20, 256, %s23_s22, [#allocation4], %s582_s23, %s582_s23, %s583_s24  }
   0x5   :  { %577 = dma.done.wait [#allocation4], 256  }
   0x6   :  { %578 = vsyncadd [#allocation4], 4294967040  ;;  %v36_v0 = vld [vmem:[#allocation3] sm:$0x1]  ;;  %v37_v1 = vld [vmem:[#allocation3 + $0x4] sm:$0x1] }
   0x7   :  { %v38_v2 = vld [vmem:[#allocation3 + $0x8] sm:$0x1]  ;;  %v39_v3 = vld [vmem:[#allocation3 + $0xc] sm:$0x1]  ;;  %v40_v4 = vunpack.c.l.bf16 %v36_v0  ;;  %v41_v5 = vunpack.c.l.bf16 %v37_v1  ;;  %v64_v7 = vld [vmem:[#allocation3] sm:$0x2] }
   0x8   :  { %v42_v6 = vunpack.c.l.bf16 %v38_v2  ;;  %v65_v8 = vld [vmem:[#allocation3 + $0x4] sm:$0x2]  ;;  %v43_v9 = vunpack.c.l.bf16 %v39_v3  ;;  %v66_v10 = vld [vmem:[#allocation3 + $0x8] sm:$0x2]  ;;  %v67_v11 = vld [vmem:[#allocation3 + $0xc] sm:$0x2]  ;;  %v68_v12 = vunpack.c.l.bf16 %v64_v7 }
   0x9   :  { %v69_v13 = vunpack.c.l.bf16 %v65_v8  ;;  %v52_v14 = vrot.slane %v40_v4, 1  ;;  %v53_v15 = vrot.slane %v41_v5, 1  ;;  %v70_v17 = vunpack.c.l.bf16 %v66_v10  ;;  %v100_v26 = vld [vmem:[#allocation3] sm:$0x4]  ;;  %v101_v27 = vld [vmem:[#allocation3 + $0x4] sm:$0x4] }
   0xa   :  { %v54_v16 = vrot.slane %v42_v6, 1  ;;  %v55_v18 = vrot.slane %v43_v9, 1  ;;  %v71_v19 = vunpack.c.l.bf16 %v67_v11  ;;  %v76_v20 = vrot.slane %v68_v12, 2  ;;  %v102_v32 = vld [vmem:[#allocation3 + $0x8] sm:$0x4]  ;;  %s483_s30 = sshll.u32 %s727_s3, 4  ;;  %s484_s30 = int_to_ptr.hbm [resolvable:$true] %s483_s30 }
   0xb   :  { %v77_v21 = vrot.slane %v69_v13, 2  ;;  %v60_v22 = vadd.f32 %v52_v14, %v40_v4  ;;  %v61_v23 = vadd.f32 %v53_v15, %v41_v5  ;;  %v78_v25 = vrot.slane %v70_v17, 2  ;;  %v103_v37 = vld [vmem:[#allocation3 + $0xc] sm:$0x4]  ;;  %v136_v46 = vld [vmem:[#allocation3] sm:$0x8] }
   0xc   :  { %v62_v24 = vadd.f32 %v54_v16, %v42_v6  ;;  %v63_v28 = vadd.f32 %v55_v18, %v43_v9  ;;  %v79_v29 = vrot.slane %v71_v19, 2  ;;  %v88_v30 = vrot.slane %v68_v12, 3  ;;  %v137_v51 = vld [vmem:[#allocation3 + $0x4] sm:$0x8]  ;;  %v138_v52 = vld [vmem:[#allocation3 + $0x8] sm:$0x8] }
   0xd   :  { %v89_v31 = vrot.slane %v69_v13, 3  ;;  %v84_v33 = vadd.f32 %v76_v20, %v60_v22  ;;  %v85_v34 = vadd.f32 %v77_v21, %v61_v23  ;;  %v90_v36 = vrot.slane %v70_v17, 3  ;;  %v139_v57 = vld [vmem:[#allocation3 + $0xc] sm:$0x8] }
   0xe   :  { %v86_v35 = vadd.f32 %v78_v25, %v62_v24  ;;  %v87_v38 = vadd.f32 %v79_v29, %v63_v28  ;;  %v91_v39 = vrot.slane %v71_v19, 3  ;;  %v104_v40 = vunpack.c.l.bf16 %v100_v26 }
   0xf   :  { %v105_v41 = vunpack.c.l.bf16 %v101_v27  ;;  %v96_v42 = vadd.f32 %v88_v30, %v84_v33  ;;  %v97_v43 = vadd.f32 %v89_v31, %v85_v34  ;;  %v106_v45 = vunpack.c.l.bf16 %v102_v32  ;;  %v279_v34 = vld [vmem:[%s726_s2] sm:$0x3] }
  0x10   :  { %v98_v44 = vadd.f32 %v90_v36, %v86_v35  ;;  %v99_v47 = vadd.f32 %v91_v39, %v87_v38  ;;  %v107_v48 = vunpack.c.l.bf16 %v103_v37  ;;  %v112_v49 = vrot.slane %v104_v40, 4 }
  0x11   :  { %v113_v50 = vrot.slane %v105_v41, 4  ;;  %v114_v53 = vrot.slane %v106_v45, 4  ;;  %v124_v54 = vrot.slane %v104_v40, 5  ;;  %v125_v55 = vrot.slane %v105_v41, 5 }
  0x12   :  { %v126_v56 = vrot.slane %v106_v45, 5  ;;  %v115_v58 = vrot.slane %v107_v48, 4  ;;  %v120_v59 = vadd.f32 %v112_v49, %v96_v42  ;;  %v127_v61 = vrot.slane %v107_v48, 5 }
  0x13   :  { %v121_v60 = vadd.f32 %v113_v50, %v97_v43  ;;  %v122_v62 = vadd.f32 %v114_v53, %v98_v44  ;;  %v140_v63 = vunpack.c.l.bf16 %v136_v46  ;;  %v141_v0 = vunpack.c.l.bf16 %v137_v51 }
  0x14   :  { %v142_v1 = vunpack.c.l.bf16 %v138_v52  ;;  %v123_v2 = vadd.f32 %v115_v58, %v99_v47  ;;  %v132_v3 = vadd.f32 %v124_v54, %v120_v59  ;;  %v143_v5 = vunpack.c.l.bf16 %v139_v57 }
  0x15   :  { %v133_v4 = vadd.f32 %v125_v55, %v121_v60  ;;  %v134_v6 = vadd.f32 %v126_v56, %v122_v62  ;;  %v148_v7 = vrot.slane %v140_v63, 6  ;;  %v149_v8 = vrot.slane %v141_v0, 6 }
  0x16   :  { %v150_v9 = vrot.slane %v142_v1, 6  ;;  %v135_v10 = vadd.f32 %v127_v61, %v123_v2  ;;  %v151_v11 = vrot.slane %v143_v5, 6  ;;  %v160_v12 = vrot.slane %v140_v63, 7 }
  0x17   :  { %v161_v13 = vrot.slane %v141_v0, 7  ;;  %v156_v14 = vadd.f32 %v148_v7, %v132_v3  ;;  %v157_v15 = vadd.f32 %v149_v8, %v133_v4  ;;  %v162_v17 = vrot.slane %v142_v1, 7 }
  0x18   :  { %v158_v16 = vadd.f32 %v150_v9, %v134_v6  ;;  %v159_v18 = vadd.f32 %v151_v11, %v135_v10  ;;  %v163_v19 = vrot.slane %v143_v5, 7  ;;  %vm185_vm0 = vcmask 1041409  }
  0x19   :  { %v168_v20 = vadd.f32 %v160_v12, %v156_v14  ;;  %v169_v21 = vadd.f32 %v161_v13, %v157_v15  ;;  %vm188_vm1 = vcmask 1042434   ;;  %vm191_vm2 = vcmask 1043459  }
  0x1a   :  { %v170_v22 = vadd.f32 %v162_v17, %v158_v16  ;;  %v171_v23 = vadd.f32 %v163_v19, %v159_v18  ;;  %vm194_vm3 = vcmask 519168   ;;  %v639_v38 = vunpack.c.l.bf16 %v279_v34 }
  0x1b   :  { %v618_v24 = vmul.f32 0.125, %v168_v20  ;;  %v620_v25 = vmul.f32 0.125, %v169_v21 }
  0x1c   :  { %v622_v26 = vmul.f32 0.125, %v170_v22  ;;  %v624_v27 = vmul.f32 0.125, %v171_v23  ;;  %v281_v41 = vmul.f32 %v639_v38, %v639_v38 }
  0x1d   :  { %v176_v28 = vmul.f32 %v618_v24, %v618_v24  ;;  %v177_v29 = vmul.f32 %v620_v25, %v620_v25 }
  0x1e   :  { %v178_v30 = vmul.f32 %v622_v26, %v622_v26  ;;  %v179_v31 = vmul.f32 %v624_v27, %v624_v27  ;;  %v282_v42 = vsel %vm194_vm3, %v281_v41, 0.0 }
  0x1f   :  { %v184_v32 = vrot.slane %v177_v29, 7 }
  0x20   :  { %v187_v33 = vrot.slane %v178_v30, 6  ;;  %v190_v35 = vrot.slane %v179_v31, 5 }
  0x21   :  { %v186_v36 = vsel %vm185_vm0, %v184_v32, %v176_v28 }
  0x22   :  { %v189_v37 = vsel %vm188_vm1, %v187_v33, %v186_v36 }
  0x23   :  { %v192_v39 = vsel %vm191_vm2, %v190_v35, %v189_v37 }
  0x24   :  { %v195_v40 = vsel %vm194_vm3, %v192_v39, 0.0 }
  0x25   :  { %196 = vadd.xlane.f32.xlu0 %v195_v40 }
  0x2d   :  { %283 = vadd.xlane.f32.xlu0 %v282_v42 }
  0x98   :  { %v197_v43 = vpop.xlane.xlu0 %196 }
  0x99   :  { %507 = vrsqrt.f32 %v197_v43  ;;  %vm205_vm4 = vcmp.eq.f32.partialorder %v197_v43, inf  ;;  %v208_v55 = vand.u32 2147483648, %v197_v43  ;;  %vm207_vm5 = vcmp.eq.f32.partialorder %v197_v43, 0.0 }
  0x9f   :  { %v508_v44 = vpop.eup %507 }
  0xa0   :  { %v199_v45 = vmul.f32 %v508_v44, %v197_v43  ;;  %v284_v46 = vpop.xlane.xlu0 %283 }
  0xa1   :  { %509 = vrsqrt.f32 %v284_v46  ;;  %vm292_vm6 = vcmp.eq.f32.partialorder %v284_v46, inf  ;;  %v295_v2 = vand.u32 2147483648, %v284_v46  ;;  %vm294_vm7 = vcmp.eq.f32.partialorder %v284_v46, 0.0 }
  0xa2   :  { %v200_v47 = vmul.f32 %v508_v44, %v199_v45 }
  0xa4   :  { %v201_v48 = vmul.f32 0.5, %v200_v47 }
  0xa6   :  { %v202_v49 = vsub.f32 1.5, %v201_v48 }
  0xa7   :  { %v510_v50 = vpop.eup %509 }
  0xa8   :  { %v203_v51 = vmul.f32 %v508_v44, %v202_v49  ;;  %v286_v52 = vmul.f32 %v510_v50, %v284_v46 }
  0xaa   :  { %v204_v53 = vmul.f32 %v203_v51, %v197_v43  ;;  %v287_v54 = vmul.f32 %v510_v50, %v286_v52 }
  0xac   :  { %v206_v56 = vsel %vm205_vm4, %v197_v43, %v204_v53  ;;  %v288_v57 = vmul.f32 0.5, %v287_v54 }
  0xad   :  { %v209_v58 = vsel %vm207_vm5, %v208_v55, %v206_v56 }
  0xae   :  { %v210_v59 = vmax.f32 %v209_v58, 1e-12  ;;  %v289_v60 = vsub.f32 1.5, %v288_v57 }
  0xb0   :  { %511 = vrcp.f32 %v210_v59  ;;  %v290_v61 = vmul.f32 %v510_v50, %v289_v60  ;;  %v212_v62 = vrot.slane %v210_v59, 1  ;;  %v644_v63 = vrot.slane %v210_v59, 2 }
  0xb1   :  { %v646_v0 = vrot.slane %v210_v59, 3  ;;  %v228_v4 = vand.u32 2147483647, %v210_v59  ;;  %v230_v6 = vand.u32 2147483648, %v210_v59  ;;  %vm224_vm8 = vweird.f32 %v210_v59 }
  0xb2   :  { %v291_v1 = vmul.f32 %v290_v61, %v284_v46  ;;  %513 = vrcp.f32 %v212_v62  ;;  %v243_v9 = vand.u32 2147483647, %v212_v62  ;;  %v245_v10 = vand.u32 2147483648, %v212_v62 }
  0xb3   :  { %515 = vrcp.f32 %v644_v63  ;;  %v258_v12 = vand.u32 2147483647, %v644_v63  ;;  %vm654_vm9 = vcmp.eq.f32.partialorder %v228_v4, 8.507059e+37  ;;  %vm239_vm10 = vweird.f32 %v212_v62 }
  0xb4   :  { %v293_v3 = vsel %vm292_vm6, %v284_v46, %v291_v1  ;;  %517 = vrcp.f32 %v646_v0  ;;  %v231_v17 = vor.u32 1.1754944e-38, %v230_v6  ;;  %v260_v19 = vand.u32 2147483648, %v644_v63 }
  0xb5   :  { %v296_v5 = vsel %vm294_vm7, %v295_v2, %v293_v3  ;;  %vm659_vm11 = vcmp.eq.f32.partialorder %v243_v9, 8.507059e+37  ;;  %v246_v21 = vor.u32 1.1754944e-38, %v245_v10  ;;  %vm254_vm12 = vweird.f32 %v644_v63 }
  0xb6   :  { %v512_v7 = vpop.eup %511  ;;  %v650_v8 = vmax.f32 %v296_v5, 1e-12  ;;  %vm665_vm14 = vcmp.eq.f32.partialorder %v258_v12, 8.507059e+37  ;;  %vm269_vm15 = vweird.f32 %v646_v0  ;;  %v273_v33 = vand.u32 2147483647, %v646_v0 }
  0xb7   :  { %v220_v11 = vmul.f32 %v512_v7, %v210_v59  ;;  %vm225_vm13 = vweird.f32 %v512_v7  ;;  %v261_v36 = vor.u32 1.1754944e-38, %v260_v19  ;;  %v275_v41 = vand.u32 2147483648, %v646_v0 }
  0xb8   :  { %v514_v13 = vpop.eup %513  ;;  %519 = vrcp.f32 %v650_v8  ;;  %vm226_vm4 = vmor %vm224_vm8, %vm225_vm13  ;;  %v307_v43 = vand.u32 2147483647, %v650_v8  ;;  %v309_v50 = vand.u32 2147483648, %v650_v8  ;;  %vm303_vm13 = vweird.f32 %v650_v8 }
  0xb9   :  { %v516_v15 = vpop.eup %515  ;;  %v221_v16 = vsub.f32 1.0, %v220_v11  ;;  %v235_v18 = vmul.f32 %v514_v13, %v212_v62  ;;  %vm240_vm3 = vweird.f32 %v514_v13  ;;  %v276_v56 = vor.u32 1.1754944e-38, %v275_v41 }
  0xba   :  { %v250_v22 = vmul.f32 %v516_v15, %v644_v63  ;;  %v518_v23 = vpop.eup %517  ;;  %vm255_vm5 = vweird.f32 %v516_v15  ;;  %vm241_vm6 = vmor %vm239_vm10, %vm240_vm3  ;;  %v310_v2 = vor.u32 1.1754944e-38, %v309_v50  ;;  %vm375_vm3 = vcmask 27648  }
  0xbb   :  { %v222_v28 = vmul.f32 %v512_v7, %v221_v16  ;;  %v236_v29 = vsub.f32 1.0, %v235_v18  ;;  %v265_v32 = vmul.f32 %v518_v23, %v646_v0  ;;  %vm270_vm7 = vweird.f32 %v518_v23  ;;  %vm256_vm8 = vmor %vm254_vm12, %vm255_vm5 }
  0xbc   :  { %v251_v31 = vsub.f32 1.0, %v250_v22  ;;  %vm271_vm10 = vmor %vm269_vm15, %vm270_vm7  ;;  %vm274_vm12 = vcmp.eq.f32.partialorder %v273_v33, 8.507059e+37  ;;  %vm333_vm15 = vcmask 523264   ;;  %vm429_vm7 = vcmask 0  }
  0xbd   :  { %v223_v34 = vadd.f32 %v512_v7, %v222_v28  ;;  %v237_v35 = vmul.f32 %v514_v13, %v236_v29  ;;  %v266_v40 = vsub.f32 1.0, %v265_v32 }
  0xbe   :  { %v520_v37 = vpop.eup %519  ;;  %v252_v39 = vmul.f32 %v516_v15, %v251_v31 }
  0xbf   :  { %v299_v42 = vmul.f32 %v520_v37, %v650_v8  ;;  %v227_v44 = vsel %vm226_vm4, %v512_v7, %v223_v34  ;;  %v238_v45 = vadd.f32 %v514_v13, %v237_v35  ;;  %v267_v48 = vmul.f32 %v518_v23, %v266_v40 }
  0xc0   :  { %v232_v46 = vsel %vm654_vm9, %v231_v17, %v227_v44  ;;  %v253_v47 = vadd.f32 %v516_v15, %v252_v39  ;;  %vm304_vm9 = vweird.f32 %v520_v37 }
  0xc1   :  { %v300_v49 = vsub.f32 1.0, %v299_v42  ;;  %v233_v51 = vmul.f32 %v232_v46, %v618_v24  ;;  %v242_v52 = vsel %vm241_vm6, %v514_v13, %v238_v45  ;;  %v268_v55 = vadd.f32 %v518_v23, %v267_v48 }
  0xc2   :  { %v247_v53 = vsel %vm659_vm11, %v246_v21, %v242_v52  ;;  %v257_v54 = vsel %vm256_vm8, %v516_v15, %v253_v47  ;;  %vm305_vm11 = vmor %vm303_vm13, %vm304_vm9  ;;  %v372_v21 = vstv %s724_s0  ;;  %vm392_vm6 = vcmask 1043456   ;;  %s584_s0 = smov [#allocation6]  }
  0xc3   :  { %v301_v57 = vmul.f32 %v520_v37, %v300_v49  ;;  %v248_v58 = vmul.f32 %v247_v53, %v620_v25  ;;  %v262_v59 = vsel %vm665_vm14, %v261_v36, %v257_v54  ;;  %v272_v60 = vsel %vm271_vm10, %v518_v23, %v268_v55  ;;  %s481_s27 = sshll.u32 %s584_s0, 4  ;;  %s482_s27 = int_to_ptr.vmem [resolvable:$true] %s481_s27 }
  0xc4   :  { %v263_v24 = vmul.f32 %v262_v59, %v622_v26  ;;  %v277_v62 = vsel %vm274_vm12, %v276_v56, %v272_v60  ;;  %v313_v63 = vpack.c.bf16 %v233_v51, %v233_v51  ;;  %vm308_vm14 = vcmp.eq.f32.partialorder %v307_v43, 8.507059e+37 }
  0xc5   :  { %v302_v61 = vadd.f32 %v520_v37, %v301_v57  ;;  %v314_v1 = vpack.c.bf16 %v248_v58, %v248_v58  ;;  %v278_v25 = vmul.f32 %v277_v62, %v624_v27  ;;  %vm473_vm8 = vcmask 3072  }
  0xc6   :  { %v315_v3 = vpack.c.bf16 %v263_v24, %v263_v24  ;;  %v322_v26 = vunpack.c.l.b16 %v313_v63 }
  0xc7   :  { %v306_v4 = vsel %vm305_vm11, %v520_v37, %v302_v61  ;;  %v323_v5 = vunpack.c.l.b16 %v314_v1  ;;  %v316_v6 = vpack.c.bf16 %v278_v25, %v278_v25 }
  0xc8   :  { %v311_v0 = vsel %vm308_vm14, %v310_v2, %v306_v4  ;;  %v324_v7 = vunpack.c.l.b16 %v315_v3 }
  0xc9   :  { %v312_v8 = vmul.f32 %v311_v0, %v639_v38  ;;  %v326_v9 = vrot.slane %v323_v5, 7  ;;  %v325_v10 = vunpack.c.l.b16 %v316_v6  ;;  %v367_v38 = vlaneseq }
  0xca   :  { %v328_v11 = vrot.slane %v324_v7, 6 }
  0xcb   :  { %v317_v12 = vpack.c.bf16 %v312_v8, %v312_v8  ;;  %v327_v13 = vsel %vm185_vm0, %v326_v9, %v322_v26  ;;  %v330_v27 = vrot.slane %v325_v10, 5  ;;  %v368_v19 = vshrl.u32 %v367_v38, 7 }
  0xcc   :  { %v329_v14 = vsel %vm188_vm1, %v328_v11, %v327_v13  ;;  %v370_v20 = vand.u32 127, %v367_v38 }
  0xcd   :  { %v338_v15 = vsel %vm333_vm15, %v317_v12, 0  ;;  %v331_v16 = vsel %vm191_vm2, %v330_v27, %v329_v14 }
  0xce   :  { %347 = vmatpush.bf16.xpose.msra.mxu0 %v338_v15  ;;  %v332_v17 = vpack.c.b16 %v331_v16, %v331_v16  ;;  %vm371_vm0 = vcmp.eq.s32.totalorder %v368_v19, %v370_v20 }
  0xd0   :  { %v335_v18 = vsel %vm333_vm15, %v332_v17, 0 }
  0xd1   :  { %360 = vmatpush.bf16.xpose.msra.mxu1 %v335_v18 }
  0xd5   :  { %501 = vmatmul.msk.bf16.vlgmr.msra.gmra.mxu0 %vm333_vm15, %v332_v17 }
  0xd8   :  { %502 = vmatmul.msk.bf16.vlgmr.msra.gmra.mxu1 %vm333_vm15, %v317_v12 }
 0x152   :  { %v349_v22 = vpop.f32.mrf.mxu0 }
 0x153   :  { %v373_v23 = vmul.f32 %v372_v21, %v349_v22  ;;  %v431_v28 = vsel %vm371_vm0, -1e+30, %v349_v22 }
 0x154   :  { %v433_v29 = vsel %vm375_vm3, %v431_v28, -inf }
 0x155   :  { %434 = vmax.xlane.f32.xlu1 %v433_v29  ;;  %v379_v30 = vsel %vm375_vm3, %v373_v23, -inf  ;;  %v362_v31 = vpop.f32.mrf.mxu1  ;;  %v374_v59 = vsel %vm371_vm0, %v373_v23, 0.0 }
 0x156   :  { %380 = vmax.xlane.f32.xlu2 %v379_v30  ;;  %v401_v32 = vmul.f32 %v372_v21, %v362_v31  ;;  %v432_v33 = vsel %vm371_vm0, -1e+30, %v362_v31  ;;  %v376_v61 = vsel %vm375_vm3, %v374_v59, 0.0 }
 0x157   :  { %v453_v35 = vsel %vm375_vm3, %v432_v33, -inf }
 0x158   :  { %v406_v36 = vsel %vm375_vm3, %v401_v32, -inf  ;;  %v402_v57 = vsel %vm371_vm0, %v401_v32, 0.0 }
 0x159   :  { %v403_v24 = vsel %vm375_vm3, %v402_v57, 0.0 }
 0x15a   :  { %v351_v34 = vpop.f32.mrf.mxu0 }
 0x15d   :  { %454 = vmax.xlane.f32.xlu1 %v453_v35  ;;  %v364_v37 = vpop.f32.mrf.mxu1 }
 0x15e   :  { %407 = vmax.xlane.f32.xlu2 %v406_v36 }
 0x1c8   :  { %v435_v39 = vpop.xlane.xlu1 %434 }
 0x1c9   :  { %vm436_vm1 = vcmp.eq.f32.partialorder %v431_v28, %v435_v39  ;;  %v381_v40 = vpop.xlane.xlu2 %380 }
 0x1ca   :  { %v437_v41 = vsel %vm436_vm1, %v370_v20, 4  ;;  %v382_v42 = vsub.f32 %v373_v23, %v381_v40 }
 0x1cb   :  { %v438_v43 = vsel %vm375_vm3, %v437_v41, 2147483647 }
 0x1cc   :  { %v383_v44 = vmul.f32 1.442695, %v382_v42  ;;  %v440_v45 = vshra.s32 %v438_v43, 16  ;;  %v439_v62 = vand.u32 65535, %v438_v43 }
 0x1ce   :  { %521 = vpow2.f32 %v383_v44  ;;  %v442_v46 = vcvt.s32.f32 %v440_v45  ;;  %v441_v1 = vcvt.s32.f32 %v439_v62 }
 0x1d0   :  { %443 = vmin.xlane.f32.xlu0 %v442_v46  ;;  %v455_v47 = vpop.xlane.xlu1 %454 }
 0x1d1   :  { %vm456_vm2 = vcmp.eq.f32.partialorder %v432_v33, %v455_v47  ;;  %v408_v48 = vpop.xlane.xlu2 %407 }
 0x1d2   :  { %v457_v49 = vsel %vm456_vm2, %v370_v20, 4  ;;  %v409_v50 = vsub.f32 %v401_v32, %v408_v48 }
 0x1d3   :  { %v458_v51 = vsel %vm375_vm3, %v457_v49, 2147483647 }
 0x1d4   :  { %v522_v52 = vpop.eup %521  ;;  %v410_v53 = vmul.f32 1.442695, %v409_v50  ;;  %v460_v54 = vshra.s32 %v458_v51, 16  ;;  %v459_v25 = vand.u32 65535, %v458_v51 }
 0x1d5   :  { %v385_v55 = vsel %vm375_vm3, %v522_v52, 0.0 }
 0x1d6   :  { %523 = vpow2.f32 %v410_v53  ;;  %386 = vadd.xlane.f32.xlu2 %v385_v55  ;;  %v462_v56 = vcvt.s32.f32 %v460_v54  ;;  %v461_v5 = vcvt.s32.f32 %v459_v25 }
 0x1d8   :  { %463 = vmin.xlane.f32.xlu1 %v462_v56 }
 0x1dc   :  { %v524_v58 = vpop.eup %523 }
 0x1dd   :  { %v412_v60 = vsel %vm375_vm3, %v524_v58, 0.0 }
 0x1de   :  { %404 = vadd.xlane.f32.xlu2 %v403_v24  ;;  %413 = vadd.xlane.f32.xlu0 %v412_v60 }
 0x1e0   :  { %377 = vadd.xlane.f32.xlu1 %v376_v61 }
 0x243   :  { %v444_v63 = vpop.xlane.xlu0 %443 }
 0x244   :  { %vm445_vm4 = vcmp.eq.f32.partialorder %v442_v46, %v444_v63  ;;  %v450_v36 = vcvt.f32.s32 %v444_v63 }
 0x245   :  { %v446_v2 = vsel %vm445_vm4, %v441_v1, inf }
 0x246   :  { %447 = vmin.xlane.f32.xlu0 %v446_v2  ;;  %v451_v39 = vshll.u32 %v450_v36, 16 }
 0x249   :  { %v387_v3 = vpop.xlane.xlu2 %386 }
 0x24a   :  { %525 = vlog2.f32 %v387_v3 }
 0x24b   :  { %v464_v4 = vpop.xlane.xlu1 %463 }
 0x24c   :  { %vm465_vm5 = vcmp.eq.f32.partialorder %v462_v56, %v464_v4  ;;  %v470_v42 = vcvt.f32.s32 %v464_v4 }
 0x24d   :  { %v466_v0 = vsel %vm465_vm5, %v461_v5, inf }
 0x24e   :  { %467 = vmin.xlane.f32.xlu1 %v466_v0  ;;  %v471_v44 = vshll.u32 %v470_v42, 16 }
 0x250   :  { %v526_v6 = vpop.eup %525 }
 0x251   :  { %v389_v7 = vmul.f32 0.6931472, %v526_v6  ;;  %v414_v8 = vpop.xlane.xlu0 %413  ;;  %v405_v16 = vpop.xlane.xlu2 %404 }
 0x252   :  { %527 = vlog2.f32 %v414_v8 }
 0x253   :  { %v390_v26 = vadd.f32 %v389_v7, %v381_v40  ;;  %v378_v9 = vpop.xlane.xlu1 %377 }
 0x255   :  { %v391_v10 = vsub.f32 %v390_v26, %v378_v9 }
 0x257   :  { %v393_v11 = vsel %vm392_vm6, %v391_v10, 0.0 }
 0x258   :  { %v528_v12 = vpop.eup %527  ;;  %v394_v13 = vrot.slane %v393_v11, 4 }
 0x259   :  { %v416_v14 = vmul.f32 0.6931472, %v528_v12 }
 0x25a   :  { %v395_v27 = vadd.f32 %v394_v13, %v393_v11 }
 0x25b   :  { %v417_v15 = vadd.f32 %v416_v14, %v408_v48 }
 0x25c   :  { %v396_v17 = vrot.slane %v395_v27, 2 }
 0x25d   :  { %v418_v18 = vsub.f32 %v417_v15, %v405_v16 }
 0x25e   :  { %v397_v20 = vadd.f32 %v396_v17, %v395_v27 }
 0x25f   :  { %v419_v38 = vsel %vm392_vm6, %v418_v18, 0.0 }
 0x260   :  { %v420_v19 = vrot.slane %v419_v38, 4  ;;  %v398_v23 = vrot.slane %v397_v20, 1 }
 0x262   :  { %v421_v21 = vadd.f32 %v420_v19, %v419_v38  ;;  %v399_v30 = vadd.f32 %v398_v23, %v397_v20 }
 0x264   :  { %v422_v22 = vrot.slane %v421_v21, 2  ;;  %v400_v33 = vmul.f32 0.25, %v399_v30 }
 0x266   :  { %v423_v28 = vadd.f32 %v422_v22, %v421_v21 }
 0x268   :  { %v424_v29 = vrot.slane %v423_v28, 1 }
 0x26a   :  { %v425_v31 = vadd.f32 %v424_v29, %v423_v28 }
 0x26c   :  { %v426_v32 = vmul.f32 0.25, %v425_v31 }
 0x26e   :  { %v427_v34 = vadd.f32 %v426_v32, %v400_v33 }
 0x270   :  { %v428_v35 = vmul.f32 0.5, %v427_v34 }
 0x272   :  { %430 = vst.msk [vmem:[#allocation6] sm:$0x1] %vm429_vm7, %v428_v35 }
 0x273   :  { %486 = dma.vmem_to_hbm [thread:$0]  %s482_s27, 16, %s484_s30, [#allocation5]  }
 0x2b9   :  { %v448_v37 = vpop.xlane.xlu0 %447 }
 0x2ba   :  { %v449_v40 = vcvt.f32.s32 %v448_v37 }
 0x2bc   :  { %v452_v41 = vadd.s32 %v451_v39, %v449_v40 }
 0x2be   :  { %474 = vst.msk [vmem:[%s729_s5] sm:$0xf] %vm473_vm8, %v452_v41 }
 0x2c1   :  { %v468_v43 = vpop.xlane.xlu1 %467 }
 0x2c2   :  { %v469_v45 = vcvt.f32.s32 %v468_v43 }
 0x2c4   :  { %v472_v46 = vadd.s32 %v471_v44, %v469_v45 }
 0x2c6   :  { %475 = vst.msk [vmem:[%s728_s4] sm:$0xf] %vm473_vm8, %v472_v46 }
 0x2c7   :  { %579 = dma.done.wait [#allocation5], 16  }
 0x2c8   :  { %580 = vsyncadd [#allocation5], 4294967280 }
 0x2c9   :  { %499 = vsyncpa [#allocation4], 1 }
 0x2ca   :  { %500 = vsyncpa [#allocation5], 1 }

</bundles_post_ra>
